<compile_context>
chip_gen: v7x
topology: tpu7x:2x2x1
jax: 0.10.0
libtpu: 0.0.40
codegen_flags: <defaults>
</compile_context>

<pallas_src>
import functools
import math
from collections import defaultdict

import numpy as np
import jax
import jax.numpy as jnp
from jax.experimental import pallas as pl
from jax.experimental.pallas import tpu as pltpu


# ----------------------------------------------------------------------------
# Generation-aware VMEM budgets.
# ----------------------------------------------------------------------------
def _tpu_vmem_capacity_bytes():
    try:
        info = pltpu.get_tpu_info()
        cap = getattr(info, "vmem_capacity_bytes", None)
        if cap:
            return int(cap)
    except Exception:
        pass
    return 64 * 1024 * 1024        # conservative default (v7x per-TC VMEM)


_VMEM_CAP_BYTES = _tpu_vmem_capacity_bytes()
_VMEM_LIMIT_BYTES = min(_VMEM_CAP_BYTES * 3 // 4, 100 * 1024 * 1024)   # 96M v5e/v6e, 48M v7x
_BLOCK_BUDGET_BYTES = max(8 * 1024 * 1024, _VMEM_LIMIT_BYTES // 3)     # 32M v5e/v6e, 16M v7x
_MAX_MASKS_PER_STEP = 16


def _round_up(x, m):
    return ((x + m - 1) // m) * m


# ----------------------------------------------------------------------------
# Host-side interpolation-matrix construction (numpy, cached).
# ----------------------------------------------------------------------------
@functools.lru_cache(maxsize=None)
def _bilinear_matrix(out_size, in_size):
    """Rows = PyTorch bilinear (align_corners=False) interpolation weights."""
    scale = in_size / out_size
    o = np.arange(out_size, dtype=np.float64)
    src = np.maximum((o + 0.5) * scale - 0.5, 0.0)
    i0 = np.clip(np.floor(src).astype(np.int64), 0, in_size - 1)
    i1 = np.minimum(i0 + 1, in_size - 1)
    w1 = (src - i0).astype(np.float32)
    w0 = 1.0 - w1
    mat = np.zeros((out_size, in_size), np.float32)
    rows = np.arange(out_size)
    np.add.at(mat, (rows, i0), w0)
    np.add.at(mat, (rows, i1), w1)      # i0 == i1 at the border -> weights sum to 1
    return mat


def _nearest_index(out_size, in_size):
    """PyTorch 'nearest' source indices (after a prefix crop to in_size)."""
    return np.minimum((np.arange(out_size) * in_size) // out_size, in_size - 1)


# ----------------------------------------------------------------------------
# Fused kernel:  sigmoid/threshold( A @ m @ B )  per mask.
#   A = S_h @ W_h (crop+nearest composed with bilinear rows), zero-padded to oh_p
#   B = W_w^T @ S_w^T, zero-padded to ow_p (multiple of 128 -> lane-dense stores)
# ----------------------------------------------------------------------------
def _fused_mask_kernel(m_ref, a_ref, b_ref, o_ref, *, return_probs, logit_thr):
    # m_ref: (TN, H, W) bf16   a_ref: (oh_p, H) bf16   b_ref: (W, ow_p) bf16
    # o_ref: (TN, oh_p, ow_p)  bf16 (probs) or uint8 (thresholded 0/1)
    a = a_ref[...]
    b = b_ref[...]
    tn = m_ref.shape[0]

    def body(n, carry):
        # First GEMM reordered to be lane-dense (N = ow_p >= 128).
        t = jnp.dot(m_ref[n], b, preferred_element_type=jnp.float32)        # (H, ow_p)
        # Second GEMM, also lane-dense.
        r = jnp.dot(a, t.astype(jnp.bfloat16),
                    preferred_element_type=jnp.float32)                     # (oh_p, ow_p)
        if return_probs:
            o_ref[n] = jax.nn.sigmoid(r).astype(o_ref.dtype)                # bf16 probs
        else:
            # sigmoid(r) > thr  <=>  r > logit(thr): no transcendental needed.
            o_ref[n] = (r > logit_thr).astype(o_ref.dtype)                  # 0/1 uint8
        return carry

    jax.lax.fori_loop(0, tn, body, 0)


def _pick_tn(q_total, h, w, oh_p, ow_p, out_bytes):
    """Largest divisor of q_total fitting the per-step VMEM budget, with a grid
    of at least 2 steps (keeps both v7x TensorCores busy)."""
    max_tn = min(q_total, _MAX_MASKS_PER_STEP)
    if q_total >= 2:
        max_tn = min(max_tn, q_total // 2)
    best = 1
    for tn in range(1, max_tn + 1):
        if q_total % tn:
            continue
        need = 2 * tn * h * w * 2                   # mask blocks, double-buffered, bf16
        need += 2 * tn * oh_p * ow_p * out_bytes    # output blocks, double-buffered
        need += 2 * (oh_p * h + w * ow_p) * 2       # A, B blocks (double-buffered), bf16
        need += h * ow_p * (4 + 2)                  # in-loop first-GEMM f32 + bf16 copy
        need += oh_p * ow_p * (4 + out_bytes)       # in-loop second-GEMM f32 + cast
        if need <= _BLOCK_BUDGET_BYTES:
            best = tn
    return best


@functools.lru_cache(maxsize=None)
def _build_fused_call(q_total, h, w, oh, ow, oh_p, ow_p, tn, return_probs, logit_thr):
    # TODO(synk): tile over output-row blocks for very large (oh_p, ow_p) outputs.
    out_dtype = jnp.bfloat16 if return_probs else jnp.uint8
    out_bytes = 2 if return_probs else 1
    kernel = functools.partial(_fused_mask_kernel,
                               return_probs=return_probs, logit_thr=logit_thr)
    cost = pl.CostEstimate(
        flops=int(2 * q_total * h * ow_p * (w + oh_p)),
        transcendentals=int(q_total * oh_p * ow_p) if return_probs else 0,
        bytes_accessed=int(q_total * h * w * 2 + (oh_p * h + w * ow_p) * 2
                           + q_total * oh_p * ow_p * out_bytes),
    )
    call = pl.pallas_call(
        kernel,
        out_shape=jax.ShapeDtypeStruct((q_total, oh_p, ow_p), out_dtype),
        grid_spec=pltpu.PrefetchScalarGridSpec(
            num_scalar_prefetch=0,
            grid=(q_total // tn,),
            in_specs=[
                pl.BlockSpec((tn, h, w), lambda i: (i, 0, 0)),
                # TODO(synk): A/B are grid-invariant; single-buffer via pl.Buffered(1).
                pl.BlockSpec((oh_p, h), lambda i: (0, 0)),
                pl.BlockSpec((w, ow_p), lambda i: (0, 0)),
            ],
            out_specs=pl.BlockSpec((tn, oh_p, ow_p), lambda i: (i, 0, 0)),
        ),
        compiler_params=pltpu.CompilerParams(
            # TODO(synk): consider pltpu.CORE_PARALLEL on v7x for explicit TC sharding.
            dimension_semantics=("parallel",),
            vmem_limit_bytes=_VMEM_LIMIT_BYTES,
        ),
        cost_estimate=cost,
    )

    def run(masks, a_mat, b_mat):
        out = call(masks, a_mat, b_mat)         # (q_total, oh_p, ow_p)
        return out[:, :oh, :ow]                 # crop padding

    return jax.jit(run)


# ----------------------------------------------------------------------------
# Module wrapper (mirrors PostProcessSegm.forward)
# ----------------------------------------------------------------------------
class PostProcessSegm:
    def __init__(self, threshold=0.5):
        self.threshold = float(threshold)
        t = min(max(self.threshold, 1e-7), 1.0 - 1e-7)
        self._logit_thr = float(math.log(t) - math.log1p(-t))
        self._mat_cache = {}

    def _matrices(self, h, w, max_h, max_w, img_h, img_w, oh, ow, oh_p, ow_p):
        key = (h, w, max_h, max_w, img_h, img_w, oh, ow, oh_p, ow_p)
        hit = self._mat_cache.get(key)
        if hit is not None:
            return hit
        wh = _bilinear_matrix(max_h, h)                      # (max_h, H)
        ww = _bilinear_matrix(max_w, w)                      # (max_w, W)
        a = np.zeros((oh_p, h), np.float32)
        a[:oh] = wh[_nearest_index(oh, img_h)]               # (oh, H) = S_h @ W_h
        bm = np.zeros((w, ow_p), np.float32)
        bm[:, :ow] = ww[_nearest_index(ow, img_w)].T         # (W, ow) = W_w^T @ S_w^T
        a = jnp.asarray(a, dtype=jnp.bfloat16)
        bm = jnp.asarray(bm, dtype=jnp.bfloat16)
        self._mat_cache[key] = (a, bm)
        return a, bm

    def __call__(self, results, outputs, orig_target_sizes, max_target_sizes,
                 return_probs=False):
        assert len(orig_target_sizes) == len(max_target_sizes)

        # Single host sync for all per-image sizes (no per-element int() syncs).
        max_np = np.asarray(jax.device_get(max_target_sizes)).astype(np.int64)
        orig_np = np.asarray(jax.device_get(orig_target_sizes)).astype(np.int64)
        max_h, max_w = [int(x) for x in max_np.max(axis=0)]

        if 'inference_masks' in outputs:
            outputs_masks = outputs['inference_masks']
        else:
            outputs_masks = jnp.squeeze(outputs['pred_masks'], axis=2)   # (B, Q, H, W)

        b, q, h, w = outputs_masks.shape
        masks_bf16 = outputs_masks.astype(jnp.bfloat16)                  # MXU-native

        out_bytes = 2 if return_probs else 1
        sub = 16 if return_probs else 32     # sublane pack of the output dtype

        # Fold images that share (img_h, img_w, oh, ow) into one pallas_call.
        groups = defaultdict(list)
        for i in range(b):
            key = (int(max_np[i, 0]), int(max_np[i, 1]),
                   int(orig_np[i, 0]), int(orig_np[i, 1]))
            groups[key].append(i)

        for (img_h, img_w, oh, ow), idxs in groups.items():
            oh_p = _round_up(oh, sub)
            ow_p = _round_up(ow, 128)        # lane-dense output stores
            a_mat, b_mat = self._matrices(h, w, max_h, max_w, img_h, img_w,
                                          oh, ow, oh_p, ow_p)
            if len(idxs) == 1:
                grp_masks = masks_bf16[idxs[0]]
            else:
                grp_masks = masks_bf16[np.asarray(idxs)].reshape(len(idxs) * q, h, w)
            q_total = len(idxs) * q
            tn = _pick_tn(q_total, h, w, oh_p, ow_p, out_bytes)
            fn = _build_fused_call(q_total, h, w, oh, ow, oh_p, ow_p, tn,
                                   bool(return_probs), self._logit_thr)
            res = fn(grp_masks, a_mat, b_mat)                # (q_total, oh, ow)
            for j, i in enumerate(idxs):
                results[i]['masks'] = res[j * q:(j + 1) * q, None, :, :]
        return results


if __name__ == "__main__":
    key = jax.random.PRNGKey(0)
    B, Q, H, W = 2, 8, 16, 16
    pred_masks = jax.random.normal(key, (B, Q, 1, H, W), dtype=jnp.float32)

    outputs = {'pred_masks': pred_masks}
    max_target_sizes = jnp.array([[24, 32], [20, 28]], dtype=jnp.int32)
    orig_target_sizes = jnp.array([[48, 64], [40, 56]], dtype=jnp.int32)

    postproc = PostProcessSegm(threshold=0.5)

    # Thresholded (default) path.
    results = [dict() for _ in range(B)]
    results = postproc(results, outputs, orig_target_sizes, max_target_sizes)
    for r in results:
        jax.block_until_ready(r['masks'])
    assert results[0]['masks'].shape == (Q, 1, 48, 64)
    assert results[1]['masks'].shape == (Q, 1, 40, 56)
    assert results[0]['masks'].dtype == jnp.uint8

    # Probability path (bf16 probs).
    results_p = [dict() for _ in range(B)]
    results_p = postproc(results_p, outputs, orig_target_sizes, max_target_sizes,
                         return_probs=True)
    for r in results_p:
        jax.block_until_ready(r['masks'])
    assert results_p[0]['masks'].shape == (Q, 1, 48, 64)
    assert results_p[1]['masks'].shape == (Q, 1, 40, 56)

    # Float32 numpy reference of the original (unfused) pipeline.
    masks_np = np.asarray(jax.device_get(jnp.squeeze(pred_masks, 2)), np.float32)
    max_np = np.asarray(jax.device_get(max_target_sizes)).astype(np.int64)
    orig_np = np.asarray(jax.device_get(orig_target_sizes)).astype(np.int64)
    mh, mw = [int(x) for x in max_np.max(axis=0)]
    wh_f = _bilinear_matrix(mh, H)
    ww_f = _bilinear_matrix(mw, W)
    total, mismatch, max_prob_err = 0, 0, 0.0
    for i in range(B):
        up = np.einsum('ah,qhw,bw->qab', wh_f, masks_np[i], ww_f)
        prob = 1.0 / (1.0 + np.exp(-up))
        thr = (prob > 0.5).astype(np.uint8)
        img_h, img_w = int(max_np[i, 0]), int(max_np[i, 1])
        oh, ow = int(orig_np[i, 0]), int(orig_np[i, 1])
        ri = _nearest_index(oh, img_h)
        ci = _nearest_index(ow, img_w)
        ref_thr = thr[:, :img_h, :img_w][:, ri][:, :, ci]
        ref_prob = prob[:, :img_h, :img_w][:, ri][:, :, ci]
        got_thr = np.asarray(jax.device_get(results[i]['masks']))[:, 0]
        got_prob = np.asarray(jax.device_get(results_p[i]['masks'])).astype(np.float32)[:, 0]
        mismatch += int((ref_thr != got_thr).sum())
        total += ref_thr.size
        max_prob_err = max(max_prob_err, float(np.abs(ref_prob - got_prob).max()))
    # bf16 matmul inputs may flip pixels whose logits sit right at the threshold.
    assert mismatch / total < 0.03, f"mask mismatch fraction {mismatch / total}"
    assert max_prob_err < 0.05, f"prob max abs error {max_prob_err}"

    print("KERNEL_OK")
</pallas_src>

<mosaic_0001>
module attributes {stable_mosaic.version = 11 : i64} {
  func.func @_fused_mask_kernel(%arg0: i32, %arg1: memref<4x16x16xbf16, #tpu.memory_space<vmem>>, %arg2: memref<64x16xbf16, #tpu.memory_space<vmem>>, %arg3: memref<16x128xbf16, #tpu.memory_space<vmem>>, %arg4: memref<4x64x128xi8, #tpu.memory_space<vmem>>) attributes {dimension_semantics = [#tpu.dimension_semantics<parallel>], iteration_bounds = array<i64: 2>, scalar_prefetch = 0 : i64, scratch_operands = 0 : i64, tpu.core_type = #tpu.core_type<tc>, window_params = [{transform_indices = @transform_0, window_bounds = array<i64: 4, 16, 16>}, {pipeline_mode = #tpu.pipeline_mode<synchronous>, transform_indices = @transform_1, window_bounds = array<i64: 64, 16>}, {pipeline_mode = #tpu.pipeline_mode<synchronous>, transform_indices = @transform_2, window_bounds = array<i64: 16, 128>}, {transform_indices = @transform_3, window_bounds = array<i64: 4, 64, 128>}]} {
    %c0 = arith.constant 0 : index
    %c0_0 = arith.constant 0 : index
    %0 = vector.load %arg2[%c0, %c0_0] : memref<64x16xbf16, #tpu.memory_space<vmem>>, vector<64x16xbf16>
    %c0_1 = arith.constant 0 : index
    %c0_2 = arith.constant 0 : index
    %1 = vector.load %arg3[%c0_1, %c0_2] : memref<16x128xbf16, #tpu.memory_space<vmem>>, vector<16x128xbf16>
    %c0_i32 = arith.constant 0 : i32
    %c4_i32 = arith.constant 4 : i32
    %2 = arith.addi %c0_i32, %c4_i32 : i32
    %c1_i32 = arith.constant 1 : i32
    scf.for %arg5 = %c0_i32 to %2 step %c1_i32  : i32 {
      %3 = arith.index_cast %arg5 : i32 to index
      %c0_4 = arith.constant 0 : index
      %c0_5 = arith.constant 0 : index
      %4 = vector.load %arg1[%3, %c0_4, %c0_5] : memref<4x16x16xbf16, #tpu.memory_space<vmem>>, vector<1x16x16xbf16>
      %5 = vector.shape_cast %4 : vector<1x16x16xbf16> to vector<16x16xbf16>
      %cst = arith.constant dense<0.000000e+00> : vector<16x128xf32>
      %6 = tpu.matmul %5, %1, %cst {dimension_numbers = #tpu.dot_dimension_numbers<[1], [0], [0], [1], [0, 0, 1, 1], [], []>} : vector<16x16xbf16>, vector<16x128xbf16>, vector<16x128xf32> -> vector<16x128xf32>
      %7 = arith.truncf %6 : vector<16x128xf32> to vector<16x128xbf16>
      %cst_6 = arith.constant dense<0.000000e+00> : vector<64x128xf32>
      %8 = tpu.matmul %0, %7, %cst_6 {dimension_numbers = #tpu.dot_dimension_numbers<[1], [0], [0], [1], [0, 0, 1, 1], [], []>} : vector<64x16xbf16>, vector<16x128xbf16>, vector<64x128xf32> -> vector<64x128xf32>
      %cst_7 = arith.constant 0.000000e+00 : f32
      %9 = vector.broadcast %cst_7 : f32 to vector<64x128xf32>
      %10 = arith.cmpf ogt, %8, %9 : vector<64x128xf32>
      %11 = arith.extui %10 : vector<64x128xi1> to vector<64x128xi8>
      %12 = arith.index_cast %arg5 : i32 to index
      %c0_8 = arith.constant 0 : index
      %c0_9 = arith.constant 0 : index
      %13 = vector.load %arg4[%12, %c0_8, %c0_9] : memref<4x64x128xi8, #tpu.memory_space<vmem>>, vector<1x64x128xi8>
      %14 = vector.shape_cast %13 : vector<1x64x128xi8> to vector<64x128xi8>
      %15 = vector.shape_cast %11 : vector<64x128xi8> to vector<1x64x128xi8>
      tpu.vector_store %arg4[%12, %c0_8, %c0_9], %15 {strides = array<i32>} : memref<4x64x128xi8, #tpu.memory_space<vmem>>, vector<1x64x128xi8>,
    }
    %c4_i32_3 = arith.constant 4 : i32
    return
  }
  func.func @transform_0(%arg0: i32) -> (i32, i32, i32) {
    %c0_i32 = arith.constant 0 : i32
    %c0_i32_0 = arith.constant 0 : i32
    %c0_i32_1 = arith.constant 0 : i32
    return %arg0, %c0_i32, %c0_i32_0 : i32, i32, i32
  }
  func.func @transform_1(%arg0: i32) -> (i32, i32) {
    %c0_i32 = arith.constant 0 : i32
    %c0_i32_0 = arith.constant 0 : i32
    %c0_i32_1 = arith.constant 0 : i32
    return %c0_i32, %c0_i32_0 : i32, i32
  }
  func.func @transform_2(%arg0: i32) -> (i32, i32) {
    %c0_i32 = arith.constant 0 : i32
    %c0_i32_0 = arith.constant 0 : i32
    %c0_i32_1 = arith.constant 0 : i32
    return %c0_i32, %c0_i32_0 : i32, i32
  }
  func.func @transform_3(%arg0: i32) -> (i32, i32, i32) {
    %c0_i32 = arith.constant 0 : i32
    %c0_i32_0 = arith.constant 0 : i32
    %c0_i32_1 = arith.constant 0 : i32
    return %arg0, %c0_i32, %c0_i32_0 : i32, i32, i32
  }
}

</mosaic_0001>

<bundles_post_ra>
// kernel: run.1
= control target key start
LH: loop header
LB: loop body
LE: loop exit
PB: predicated region body
PF: predicated region fallthrough
CT: control target
= control target key end

     0   :  { %8 = vsyncpa [#allocation3], 0  ;;  %s914_s0 = inlined_call_operand.hbm [shape: bf16[8,16,16], index: 0, kind: input, shape index: {}]   ;;  %s915_s1 = inlined_call_operand.vmem [shape: bf16[64,16], index: 1, kind: input, shape index: {}]   ;;  %s916_s2 = inlined_call_operand.vmem [shape: bf16[16,128], index: 2, kind: input, shape index: {}]   ;;  %s917_s3 = inlined_call_operand.vmem [shape: u8[8,64,128], index: 3, kind: output, shape index: {}]  }
   0x1   :  { %10 = vsyncpa [#allocation3 + $0x1], 0  ;;  %s714_s12 = smov 0   ;;  %s716_s13 = smov 0  }
   0x2   :  { %s718_s14 = smov 0   ;;  %s720_s15 = smov 0  }
   0x3 LB: > { %s503_s16 = sadd.s32 4294967295, %s682_s15   ;;  %s734_s17 = sadd.s32 1, %s682_s15   ;;  %s682_s15 = sphi %s720_s15, %s924_s15   ;;  %s678_s14 = sphi %s718_s14, %s923_s14   ;;  %s674_s13 = sphi %s716_s13, %s922_s13   ;;  %s670_s12 = sphi %s714_s12, %s921_s12  }
   0x4   : > { %s20_s18 = ssub.s32 %s682_s15, %s734_s17  ;;  %s23_s19 = sadd.s32 1, %s678_s14 }
   0x5   : > { %p21_p0 = scmp.eq.s32.totalorder %s20_s18, 0  ;;  %p30_p1 = scmp.ne.s32.totalorder %s678_s14, %s674_s13 }
   0x6   : > { %p31_p2 = scmp.eq.s32.totalorder %s682_s15, 0  ;;  %p36_p3 = scmp.ne.s32.totalorder %s674_s13, %s670_s12 }
   0x7   : > { %s744_s20 = scalar_select %p21_p0, %s678_s14, %s23_s19  }
   0x8   : > { %p32_p4 = por %p31_p2, %p30_p1  ;;  %p37_p5 = scmp.eq.s32.totalorder %s503_s16, 0 }
   0x9   : > { %p567_p6 = scmp.lt.s32.totalorder %s682_s15, 2  ;;  %s134_s22 = sand.u32 1, %s678_s14  }
   0xa   : > { %p749_p7 = por %p37_p5, %p36_p3  ;;  %s507_s23 = sshll.u32 %s134_s22, 5 }
   0xb   : > { %s534_s24 = sshll.u32 %s682_s15, 9  ;;  %s138_s28 = scalar_lea.vmem [#allocation2], %s507_s23 }
   0xc   : > { %s758_s27 = scalar_lea.hbm %s914_s0, %s534_s24  ;;  %s146_s29 = sshll.u32 %s138_s28, 4  ;;  %s760_s29 = int_to_ptr.vmem [resolvable:$true] %s146_s29 }
   0xd   : > { %p762_p8 = pnand %p567_p6, %p32_p4  ;;  %s767_s4 = scalar_lea.sflag [#allocation3], %s134_s22 }
   0xe   : > { %s614_s5 = scalar_lea.hbm %s758_s27, 512  ;;  %s619_s8 = scalar_lea.hbm %s914_s0, 1024 }
   0xf   : > { %p615_p10 = scmp.ne.s32.totalorder %s758_s27, %s614_s5  ;;  %p616_p11 = pneg %p762_p8 }
  0x10   : > { %p620_p0 = scmp.lt.u32.totalorder %s758_s27, %s914_s0  ;;  %p621_p1 = scmp.lt.u32.totalorder %s619_s8, %s614_s5 }
  0x11   : > { %p617_p12 = pnand %p616_p11, %p615_p10  ;;  %p623_p3 = scmp.lt.u32.totalorder %s614_s5, %s758_s27 }
  0x12   : > { %p622_p2 = por %p621_p1, %p620_p0 }
  0x13   : > { %p618_p13 = pneg %p617_p12 }
  0x14   : > { %p624_p4 = por %p623_p3, %p622_p2 }
  0x16   : > { %p625_p5 = pnand %p624_p4, %p618_p13 }
  0x18   : > { %628 = shalt.err (!%p625_p5)
}
  0x19   : > { %s629_s11 = scalar_lea.vmem %s760_s29, 512  ;;  %s688_s12 = smov [#allocation2]  }
  0x1a   : > { %p630_p6 = scmp.ne.s32.totalorder %s760_s29, %s629_s11  ;;  %s634_s18 = sshll.u32 %s688_s12, 4  ;;  %s635_s18 = int_to_ptr.vmem [resolvable:$false] %s634_s18 }
  0x1b   : > { %s636_s19 = scalar_lea.vmem %s635_s18, 1024  ;;  %p637_p9 = scmp.lt.s32.totalorder %s760_s29, %s635_s18 }
  0x1c   : > { %p632_p10 = pnand %p630_p6, %p616_p11  ;;  %p638_p0 = scmp.lt.s32.totalorder %s636_s19, %s629_s11 }
  0x1e   : > { %p633_p12 = pneg %p632_p10  ;;  %p639_p1 = por %p638_p0, %p637_p9 }
  0x20   : > { %p640_p2 = pnand %p639_p1, %p633_p12 }
  0x22   : > { %643 = shalt.err (!%p640_p2)
}
  0x23   : > { %s689_s22 = smov 64   ;;  %s690_s23 = smov 4  }
  0x24   : > { %566 = dma.hbm_to_vmem [thread:$0]  (!%p762_p8), %s758_s27, 512, %s760_s29, %s767_s4, %s689_s22, %s689_s22, %s690_s23  }
  0x25   : > { %p154_p11 = scmp.lt.s32.totalorder %s682_s15, 3  ;;  %p920_p13 = scmp.ge.s32.totalorder %s682_s15, 1 }
  0x27   : > { %p155_p3 = pnand %p920_p13, %p154_p11 }
  0x28   : > { %s160_s24 = sand.u32 (!%p155_p3), 1, %s674_s13  }
  0x29   : > { %158 = sbr.rel (%p155_p3) target bundleno = 518 (0x206), region = 32  ;;  %s799_s25 = sshll.u32 (!%p155_p3), %s160_s24, 5 }
  0x2a   : > { %s161_s26 = scalar_lea.sflag (!%p155_p3), [#allocation3], %s160_s24  ;;  %s164_s28 = scalar_lea.vmem (!%p155_p3), [#allocation2], %s799_s25 }
  0x30   : > { %665 = dma.done.wait (%p749_p7), %s161_s26, 512  }
  0x31   : > { %667 = vsyncadd (%p749_p7), %s161_s26, 4294966784  ;;  %s513_s27 = sshll.u32 %s503_s16, 2  ;;  %v816_v0 = vld [vmem:[%s915_s1] sm:$0xf]  ;;  %v821_v1 = vld [vmem:[%s915_s1 + $0x4] sm:$0xf] }
  0x32   : > { %p190_p8 = scmp.lt.s32.totalorder %s513_s27, 7  ;;  %v826_v2 = vld [vmem:[%s915_s1 + $0x8] sm:$0xf]  ;;  %v831_v3 = vld [vmem:[%s915_s1 + $0xc] sm:$0xf]  ;;  %s863_s6 = smov 0  }
  0x33   : > { %v836_v4 = vld [vmem:[%s915_s1 + $0x10] sm:$0xf]  ;;  %v841_v5 = vld [vmem:[%s915_s1 + $0x14] sm:$0xf]  ;;  %v846_v6 = vld [vmem:[%s915_s1 + $0x18] sm:$0xf] }
  0x34   : > { %s926_s27 = smov (!%p190_p8, %s513_s27), 7  ;;  %v851_v7 = vld [vmem:[%s915_s1 + $0x1c] sm:$0xf]  ;;  %v856_v8 = vld [vmem:[%s916_s2] sm:$0xf] }
  0x35   : > { %s535_s29 = sshll.u32 %s926_s27, 4  ;;  %v861_v9 = vld [vmem:[%s916_s2 + $0x4] sm:$0xf] }
  0x36   : > { %s811_s5 = scalar_lea.vmem %s917_s3, %s535_s29 }
  0x37 LB: >> { %v519_v10 = vcombine.low %v856_v8, %v861_v9  ;;  %v691_v11 = vmov 0.0   ;;  %vm692_vm0 = vmmov 0   ;;  %s536_s7 = sshll.u32 %s686_s6, 3  ;;  %vm231_vm1 = vcmask 130048   ;;  %s537_s9 = sshll.u32 %s686_s6, 4  ;;  %s686_s6 = sphi %s863_s6, %s214_s6  }
  0x38   : >> { %545 = vmatprep.subr.bf16.mxu0 %v691_v11  ;;  %547 = vmatprep.mubr.msk.bf16.mxu0 %vm692_vm0, %v691_v11  ;;  %s217_s8 = scalar_lea.vmem %s164_s28, %s536_s7 [#allocation2]  ;;  %v521_v13 = vcombine.low %v816_v0, %v821_v1  ;;  %v522_v19 = vcombine.low %v826_v2, %v831_v3  ;;  %v523_v20 = vcombine.low %v836_v4, %v841_v5  ;;  %v693_v26 = vmov 0   ;;  %s888_s15 = scalar_lea.vmem %s811_s5, %s537_s9 }
  0x39   : >> { %546 = vmatpush3.bf16.msra.mxu0 %v519_v10  ;;  %v613_v12 = vld [vmem:[%s217_s8] sm:$0xff]   ;;  %v524_v21 = vcombine.low %v846_v6, %v851_v7  ;;  %s214_s6 = sadd.s32 1, %s686_s6  }
  0x3a   : >> { %553 = vmatprep.mubr.msk.bf16.mxu1 %vm231_vm1, %v521_v13  ;;  %p211_p7 = scmp.ge.s32.totalorder %s214_s6, 4  }
  0x3c   : >> { %548 = vmatmul.mubr.msk.bf16.vlgmr.msra.gmra.mrb[0].mxu0 %vm231_vm1, %v613_v12 }
 0x10f   : >> { %v269_v14 = vpop.f32.mrb[0].mxu0 }
 0x110   : >> { %v549_v15 = vpop.f32.mrb[1].mxu0 }
 0x111   : >> { %v272_v16 = vpop.f32.mrb[2].mxu0 }
 0x112   : >> { %v276_v17 = vpack.c.bf16 %v272_v16, %v269_v14  ;;  %v550_v18 = vpop.f32.mrb[3].mxu0 }
 0x114   : >> { %551 = vmatprep.subr.bf16.mxu1 %v276_v17 }
 0x115   : >> { %552 = vmatpush3.bf16.msra.mxu1 %v276_v17 }
 0x118   : >> { %554 = vmatmul.mubr.msk.bf16.vlgmr.msra.gmra.mrb[0].mxu1 %vm231_vm1, %v522_v19 }
 0x119   : >> { %557 = vmatprep.mubr.msk.bf16.mxu1 %vm231_vm1, %v523_v20 }
 0x120   : >> { %558 = vmatmul.mubr.msk.bf16.gmra.mrb[4].mxu1 %vm231_vm1, %v524_v21 }
 0x1eb   : >> { %v555_v22 = vpop.f32.mrb[0].mxu1 }
 0x1ec   : >> { %v343_v23 = vpop.f32.mrb[1].mxu1  ;;  %vm376_vm2 = vcmp.gt.f32.partialorder %v555_v22, 0.0 }
 0x1ed   : >> { %v556_v24 = vpop.f32.mrb[2].mxu1  ;;  %vm374_vm4 = vcmp.gt.f32.partialorder %v343_v23, 0.0 }
 0x1ee   : >> { %vm377_vm3 = vcmp.gt.f32.partialorder %v556_v24, 0.0  ;;  %v346_v25 = vpop.f32.mrb[3].mxu1 }
 0x1ef   : >> { %vm383_vm5 = vmpackc.low %vm377_vm3, %vm376_vm2  ;;  %vm375_vm6 = vcmp.gt.f32.partialorder %v346_v25, 0.0 }
 0x1f0   : >> { %vm382_vm7 = vmpackc.low %vm375_vm6, %vm374_vm4 }
 0x1f1   : >> { %vm384_vm8 = vmpackc.even %vm383_vm5, %vm382_vm7 }
 0x1f2   : >> { %v388_v27 = vsel %vm384_vm8, 16843009, %v693_v26 }
 0x1f3   : >> { %v390_v28 = vunpack.c.0.s8 %v388_v27  ;;  %v391_v29 = vunpack.c.1.s8 %v388_v27  ;;  %v392_v30 = vunpack.c.2.s8 %v388_v27  ;;  %v393_v31 = vunpack.c.3.s8 %v388_v27  ;;  %v559_v32 = vpop.f32.mrb[4].mxu1 }
 0x1f4   : >> { %v359_v33 = vpop.f32.mrb[5].mxu1  ;;  %vm380_vm9 = vcmp.gt.f32.partialorder %v559_v32, 0.0 }
 0x1f5   : >> { %v398_v34 = vpack.c.b16 %v390_v28, %v390_v28  ;;  %v400_v35 = vpack.c.b16 %v391_v29, %v391_v29  ;;  %v402_v36 = vpack.c.b16 %v392_v30, %v392_v30  ;;  %v404_v37 = vpack.c.b16 %v393_v31, %v393_v31  ;;  %v560_v38 = vpop.f32.mrb[6].mxu1 }
 0x1f6   : >> { %vm381_vm10 = vcmp.gt.f32.partialorder %v560_v38, 0.0  ;;  %v362_v39 = vpop.f32.mrb[7].mxu1  ;;  %vm378_vm12 = vcmp.gt.f32.partialorder %v359_v33, 0.0 }
 0x1f7   : >> { %v399_v40 = vpack.c.b8 %v398_v34, %v398_v34  ;;  %v401_v41 = vpack.c.b8 %v400_v35, %v400_v35  ;;  %v403_v42 = vpack.c.b8 %v402_v36, %v402_v36  ;;  %v405_v43 = vpack.c.b8 %v404_v37, %v404_v37  ;;  %vm386_vm11 = vmpackc.low %vm381_vm10, %vm380_vm9 }
 0x1f8   : >> { %vm379_vm13 = vcmp.gt.f32.partialorder %v362_v39, 0.0 }
 0x1f9   : >> { %417 = vst [vmem:[%s888_s15] sm:$0x3] %v399_v40  ;;  %418 = vst [vmem:[%s888_s15 + $0x2] sm:$0x3] %v401_v41 }
 0x1fa   : >> { %419 = vst [vmem:[%s888_s15 + $0x4] sm:$0x3] %v403_v42  ;;  %420 = vst [vmem:[%s888_s15 + $0x6] sm:$0x3] %v405_v43 }
 0x1fb   : >> { %vm385_vm14 = vmpackc.low %vm379_vm13, %vm378_vm12 }
 0x1fc   : >> { %vm387_vm15 = vmpackc.even %vm386_vm11, %vm385_vm14 }
 0x1fd   : >> { %v389_v44 = vsel %vm387_vm15, 16843009, %v693_v26 }
 0x1fe   : >> { %v394_v45 = vunpack.c.0.s8 %v389_v44  ;;  %v395_v46 = vunpack.c.1.s8 %v389_v44  ;;  %v396_v47 = vunpack.c.2.s8 %v389_v44  ;;  %v397_v48 = vunpack.c.3.s8 %v389_v44 }
 0x1ff   : > { %213 = sbr.rel (!%p211_p7) target bundleno = 55 (0x37), region = 81 }
 0x200   : >> { %v406_v49 = vpack.c.b16 %v394_v45, %v394_v45  ;;  %v408_v50 = vpack.c.b16 %v395_v46, %v395_v46  ;;  %v410_v51 = vpack.c.b16 %v396_v47, %v396_v47  ;;  %v412_v52 = vpack.c.b16 %v397_v48, %v397_v48 }
 0x202   : >> { %v407_v53 = vpack.c.b8 %v406_v49, %v406_v49  ;;  %v409_v54 = vpack.c.b8 %v408_v50, %v408_v50  ;;  %v411_v55 = vpack.c.b8 %v410_v51, %v410_v51  ;;  %v413_v56 = vpack.c.b8 %v412_v52, %v412_v52 }
 0x204   : >> { %421 = vst [vmem:[%s888_s15 + $0x8] sm:$0x3] %v407_v53  ;;  %422 = vst [vmem:[%s888_s15 + $0xa] sm:$0x3] %v409_v54 }
 0x205   : >> { %423 = vst [vmem:[%s888_s15 + $0xc] sm:$0x3] %v411_v55  ;;  %424 = vst [vmem:[%s888_s15 + $0xe] sm:$0x3] %v413_v56 }
 0x206 PF: > { %p13_p9 = scmp.ge.s32.totalorder %s734_s17, 4   ;;  %s921_s12 = smov %s674_s13 }
 0x207   : > { %s922_s13 = smov %s678_s14  ;;  %s923_s14 = smov %s744_s20 }
 0x208   : > { %s924_s15 = smov %s734_s17  ;;  %15 = sbr.rel (!%p13_p9) target bundleno = 3 (0x3), region = 92 }
 0x20f   :  { %449 = vsyncpa [#allocation3], 1 }
 0x210   :  { %451 = vsyncpa [#allocation3 + $0x1], 1 }

</bundles_post_ra>
